<compile_context>
chip_gen: v5e
topology: v5e:2x2
jax: 0.10.0
libtpu: 0.0.40
codegen_flags: <defaults>
</compile_context>

<pallas_src>
import functools

import jax
import jax.numpy as jnp
from jax.experimental import pallas as pl
from jax.experimental.pallas import tpu as pltpu


# ----------------------------------------------------------------------------
# Kernels
# ----------------------------------------------------------------------------
def _proj_kernel(x_ref, w1_ref, b1_ref, w2_ref, b2_ref, o_ref):
    """Fused conv1(1x1)+BN1+ReLU -> conv2(1x1)+BN2 -> L2 normalize (f32 math)."""
    x = x_ref[0]                                           # (tn, C) f32
    h = jnp.dot(x, w1_ref[...], preferred_element_type=jnp.float32)
    h = jnp.maximum(h + b1_ref[...], 0.0)                  # folded BN1 + ReLU
    p = jnp.dot(h, w2_ref[...], preferred_element_type=jnp.float32)
    p = p + b2_ref[...]                                    # folded BN2
    # F.normalize(p=2): p / max(||p||_2, 1e-12), computed in f32.
    ss = jnp.sum(p * p, axis=-1, keepdims=True)
    inv = 1.0 / jnp.maximum(jnp.sqrt(ss), 1e-12)
    o_ref[0] = (p * inv).astype(o_ref.dtype)               # store as bf16


def _gram_kernel(p_ref, q_ref, o_ref):
    """One (tq, tj) tile of |P @ P^T|; full K contracted, abs fused in epilogue."""
    p = p_ref[0]                                           # (tq, K) bf16
    q = q_ref[0]                                           # (tj, K) bf16
    # P @ Q^T via dot_general contracting the last dims of both operands, so
    # the transpose rides the MXU weight-load path (no XLU transpose / copy).
    g = jax.lax.dot_general(p, q, (((1,), (1,)), ((), ())),
                            preferred_element_type=jnp.float32)
    o_ref[0] = jnp.abs(g).astype(o_ref.dtype)


# ----------------------------------------------------------------------------
# Wrapper
# ----------------------------------------------------------------------------
def _pick_tile(n, candidates=(512, 256, 128, 64, 32, 16, 8)):
    for t in candidates:
        if t <= n and n % t == 0:
            return t
    return n


@functools.partial(jax.jit, static_argnames=("out_dtype",))
def scaled_dot_forward(x_bcn, w1, b1, w2, b2, *, out_dtype=jnp.float32):
    """ScaledDot forward.

    x_bcn : (B, C, N) f32 input in PyTorch NCW layout.
    w1    : (C, 128)  conv1 weight with eval-mode BN1 folded in.
    b1    : (128,)    folded bias.
    w2    : (128,256) conv2 weight with eval-mode BN2 folded in.
    b2    : (256,)    folded bias.
    Returns |proj^T proj| of shape (B, N, N) in `out_dtype` (f32 matches the
    PyTorch module; pass jnp.bfloat16 to halve the writeback bytes).
    """
    B, C, N = x_bcn.shape
    H1 = w1.shape[1]
    H2 = w2.shape[1]

    x = jnp.transpose(x_bcn, (0, 2, 1))                    # (B, N, C) channels-last

    # -------- Pass 1: proj = normalize(MLP(x)) as bf16 (B, N, H2) -----------
    tn = _pick_tile(N)
    proj = pl.pallas_call(
        _proj_kernel,
        out_shape=jax.ShapeDtypeStruct((B, N, H2), jnp.bfloat16),
        grid=(B, N // tn),
        in_specs=[
            pl.BlockSpec((1, tn, C), lambda b, i: (b, i, 0)),
            # Weights / biases: constant index_map -> hoisted, VMEM-resident.
            pl.BlockSpec((C, H1), lambda b, i: (0, 0)),
            pl.BlockSpec((1, H1), lambda b, i: (0, 0)),
            pl.BlockSpec((H1, H2), lambda b, i: (0, 0)),
            pl.BlockSpec((1, H2), lambda b, i: (0, 0)),
        ],
        out_specs=pl.BlockSpec((1, tn, H2), lambda b, i: (b, i, 0)),
        compiler_params=pltpu.CompilerParams(
            dimension_semantics=("parallel", "parallel")),
    )(x, w1, b1.reshape(1, H1), w2, b2.reshape(1, H2))

    # -------- Pass 2: out = |proj @ proj^T| (B, N, N) ------------------------
    tq = _pick_tile(N)
    tj = _pick_tile(N)
    out = pl.pallas_call(
        _gram_kernel,
        out_shape=jax.ShapeDtypeStruct((B, N, N), out_dtype),
        grid=(B, N // tq, N // tj),
        in_specs=[
            # LHS keyed on (b, i) only -> stays resident while j streams.
            pl.BlockSpec((1, tq, H2), lambda b, i, j: (b, i, 0)),
            pl.BlockSpec((1, tj, H2), lambda b, i, j: (b, j, 0)),
        ],
        out_specs=pl.BlockSpec((1, tq, tj), lambda b, i, j: (b, i, j)),
        compiler_params=pltpu.CompilerParams(
            dimension_semantics=("parallel", "parallel", "parallel")),
    )(proj, proj)
    return out


# ----------------------------------------------------------------------------
# Glue: eval-mode BatchNorm folding + pure-JAX reference
# ----------------------------------------------------------------------------
def fold_conv_bn(w, b, gamma, beta, mean, var, eps=1e-5):
    """Fold eval-mode BatchNorm1d into a preceding Conv1d(kernel_size=1).

    w: (out, in), b: (out,). Returns folded (w, b) with the same shapes.
    """
    scale = gamma / jnp.sqrt(var + eps)
    return w * scale[:, None], (b - mean) * scale + beta


def _reference_forward(x_bcn, w1, b1, w2, b2):
    x = jnp.transpose(x_bcn, (0, 2, 1))
    h = jnp.maximum(x @ w1 + b1, 0.0)
    p = h @ w2 + b2
    nrm = jnp.maximum(jnp.sqrt(jnp.sum(p * p, axis=-1, keepdims=True)), 1e-12)
    p = p / nrm
    return jnp.abs(jnp.einsum("bnc,bmc->bnm", p, p))


# ----------------------------------------------------------------------------
# Demo / self-test
# ----------------------------------------------------------------------------
if __name__ == "__main__":
    key = jax.random.PRNGKey(0)
    B, C, N = 2, 8, 16            # small test shapes (d_model=8, 16 points)
    H1, H2 = 128, 256             # hidden dims fixed by the module
    ks = jax.random.split(key, 14)

    x = jax.random.normal(ks[0], (B, C, N), jnp.float32)

    # Raw PyTorch-style parameters (conv weights squeezed from (out,in,1)).
    conv1_w = 0.2 * jax.random.normal(ks[1], (H1, C), jnp.float32)
    conv1_b = 0.1 * jax.random.normal(ks[2], (H1,), jnp.float32)
    bn1_g = 1.0 + 0.1 * jax.random.normal(ks[3], (H1,), jnp.float32)
    bn1_b = 0.1 * jax.random.normal(ks[4], (H1,), jnp.float32)
    bn1_m = 0.1 * jax.random.normal(ks[5], (H1,), jnp.float32)
    bn1_v = jax.random.uniform(ks[6], (H1,), jnp.float32, minval=0.5, maxval=1.5)

    conv2_w = 0.1 * jax.random.normal(ks[7], (H2, H1), jnp.float32)
    conv2_b = 0.1 * jax.random.normal(ks[8], (H2,), jnp.float32)
    bn2_g = 1.0 + 0.1 * jax.random.normal(ks[9], (H2,), jnp.float32)
    bn2_b = 0.1 * jax.random.normal(ks[10], (H2,), jnp.float32)
    bn2_m = 0.1 * jax.random.normal(ks[11], (H2,), jnp.float32)
    bn2_v = jax.random.uniform(ks[12], (H2,), jnp.float32, minval=0.5, maxval=1.5)

    # Fold BN1 into conv1 and BN2 into conv2 (eval mode); transpose to
    # channels-last matmul layout: (C, H1) and (H1, H2).
    w1f, b1f = fold_conv_bn(conv1_w, conv1_b, bn1_g, bn1_b, bn1_m, bn1_v)
    w2f, b2f = fold_conv_bn(conv2_w, conv2_b, bn2_g, bn2_b, bn2_m, bn2_v)
    w1f, w2f = w1f.T, w2f.T

    out = scaled_dot_forward(x, w1f, b1f, w2f, b2f)
    out = jax.block_until_ready(out)

    ref = _reference_forward(x, w1f, b1f, w2f, b2f)
    err = float(jnp.max(jnp.abs(out.astype(jnp.float32) - ref)))
    assert out.shape == (B, N, N), out.shape
    assert err < 5e-2, f"max abs error too large: {err}"

    print("KERNEL_OK")
</pallas_src>

<mosaic_0001>
module attributes {stable_mosaic.version = 11 : i64} {
  func.func @_gram_kernel(%arg0: i32, %arg1: i32, %arg2: i32, %arg3: memref<1x16x256xbf16, #tpu.memory_space<vmem>>, %arg4: memref<1x16x256xbf16, #tpu.memory_space<vmem>>, %arg5: memref<1x16x16xf32, #tpu.memory_space<vmem>>) attributes {dimension_semantics = [#tpu.dimension_semantics<parallel>, #tpu.dimension_semantics<parallel>, #tpu.dimension_semantics<parallel>], iteration_bounds = array<i64: 2, 1, 1>, scalar_prefetch = 0 : i64, scratch_operands = 0 : i64, tpu.core_type = #tpu.core_type<tc>, window_params = [{transform_indices = @transform_0, window_bounds = array<i64: 1, 16, 256>}, {transform_indices = @transform_1, window_bounds = array<i64: 1, 16, 256>}, {transform_indices = @transform_2, window_bounds = array<i64: 1, 16, 16>}]} {
    %c0 = arith.constant 0 : index
    %c0_0 = arith.constant 0 : index
    %c0_1 = arith.constant 0 : index
    %0 = vector.load %arg3[%c0, %c0_0, %c0_1] : memref<1x16x256xbf16, #tpu.memory_space<vmem>>, vector<1x16x256xbf16>
    %1 = vector.shape_cast %0 : vector<1x16x256xbf16> to vector<16x256xbf16>
    %c0_2 = arith.constant 0 : index
    %c0_3 = arith.constant 0 : index
    %c0_4 = arith.constant 0 : index
    %2 = vector.load %arg4[%c0_2, %c0_3, %c0_4] : memref<1x16x256xbf16, #tpu.memory_space<vmem>>, vector<1x16x256xbf16>
    %3 = vector.shape_cast %2 : vector<1x16x256xbf16> to vector<16x256xbf16>
    %cst = arith.constant dense<0.000000e+00> : vector<16x16xf32>
    %4 = tpu.matmul %1, %3, %cst {dimension_numbers = #tpu.dot_dimension_numbers<[1], [1], [0], [0], [0, 0, 1, 0], [], []>} : vector<16x256xbf16>, vector<16x256xbf16>, vector<16x16xf32> -> vector<16x16xf32>
    %5 = math.absf %4 : vector<16x16xf32>
    %c0_5 = arith.constant 0 : index
    %c0_6 = arith.constant 0 : index
    %c0_7 = arith.constant 0 : index
    %6 = vector.load %arg5[%c0_5, %c0_6, %c0_7] : memref<1x16x16xf32, #tpu.memory_space<vmem>>, vector<1x16x16xf32>
    %7 = vector.shape_cast %6 : vector<1x16x16xf32> to vector<16x16xf32>
    %8 = vector.shape_cast %5 : vector<16x16xf32> to vector<1x16x16xf32>
    tpu.vector_store %arg5[%c0_5, %c0_6, %c0_7], %8 {strides = array<i32>} : memref<1x16x16xf32, #tpu.memory_space<vmem>>, vector<1x16x16xf32>,
    return
  }
  func.func @transform_0(%arg0: i32, %arg1: i32, %arg2: i32) -> (i32, i32, i32) {
    %c0_i32 = arith.constant 0 : i32
    %c0_i32_0 = arith.constant 0 : i32
    return %arg0, %arg1, %c0_i32 : i32, i32, i32
  }
  func.func @transform_1(%arg0: i32, %arg1: i32, %arg2: i32) -> (i32, i32, i32) {
    %c0_i32 = arith.constant 0 : i32
    %c0_i32_0 = arith.constant 0 : i32
    return %arg0, %arg2, %c0_i32 : i32, i32, i32
  }
  func.func @transform_2(%arg0: i32, %arg1: i32, %arg2: i32) -> (i32, i32, i32) {
    %c0_i32 = arith.constant 0 : i32
    return %arg0, %arg1, %arg2 : i32, i32, i32
  }
}

module attributes {stable_mosaic.version = 11 : i64} {
  func.func @_proj_kernel(%arg0: i32, %arg1: i32, %arg2: memref<1x16x8xf32, #tpu.memory_space<vmem>>, %arg3: memref<8x128xf32, #tpu.memory_space<vmem>>, %arg4: memref<1x128xf32, #tpu.memory_space<vmem>>, %arg5: memref<128x256xf32, #tpu.memory_space<vmem>>, %arg6: memref<1x256xf32, #tpu.memory_space<vmem>>, %arg7: memref<1x16x256xbf16, #tpu.memory_space<vmem>>) attributes {dimension_semantics = [#tpu.dimension_semantics<parallel>, #tpu.dimension_semantics<parallel>], iteration_bounds = array<i64: 2, 1>, scalar_prefetch = 0 : i64, scratch_operands = 0 : i64, tpu.core_type = #tpu.core_type<tc>, window_params = [{transform_indices = @transform_0, window_bounds = array<i64: 1, 16, 8>}, {pipeline_mode = #tpu.pipeline_mode<synchronous>, transform_indices = @transform_1, window_bounds = array<i64: 8, 128>}, {pipeline_mode = #tpu.pipeline_mode<synchronous>, transform_indices = @transform_2, window_bounds = array<i64: 1, 128>}, {pipeline_mode = #tpu.pipeline_mode<synchronous>, transform_indices = @transform_3, window_bounds = array<i64: 128, 256>}, {pipeline_mode = #tpu.pipeline_mode<synchronous>, transform_indices = @transform_4, window_bounds = array<i64: 1, 256>}, {transform_indices = @transform_5, window_bounds = array<i64: 1, 16, 256>}]} {
    %c0 = arith.constant 0 : index
    %c0_0 = arith.constant 0 : index
    %c0_1 = arith.constant 0 : index
    %0 = vector.load %arg2[%c0, %c0_0, %c0_1] : memref<1x16x8xf32, #tpu.memory_space<vmem>>, vector<1x16x8xf32>
    %1 = vector.shape_cast %0 : vector<1x16x8xf32> to vector<16x8xf32>
    %c0_2 = arith.constant 0 : index
    %c0_3 = arith.constant 0 : index
    %2 = vector.load %arg3[%c0_2, %c0_3] : memref<8x128xf32, #tpu.memory_space<vmem>>, vector<8x128xf32>
    %cst = arith.constant dense<0.000000e+00> : vector<16x128xf32>
    %3 = tpu.matmul %1, %2, %cst {dimension_numbers = #tpu.dot_dimension_numbers<[1], [0], [0], [1], [0, 0, 1, 1], [], []>} : vector<16x8xf32>, vector<8x128xf32>, vector<16x128xf32> -> vector<16x128xf32>
    %c0_4 = arith.constant 0 : index
    %c0_5 = arith.constant 0 : index
    %4 = vector.load %arg4[%c0_4, %c0_5] : memref<1x128xf32, #tpu.memory_space<vmem>>, vector<1x128xf32>
    %5 = vector.broadcast %4 : vector<1x128xf32> to vector<16x128xf32>
    %6 = arith.addf %3, %5 : vector<16x128xf32>
    %cst_6 = arith.constant 0.000000e+00 : f32
    %7 = vector.broadcast %cst_6 : f32 to vector<16x128xf32>
    %8 = arith.maximumf %6, %7 : vector<16x128xf32>
    %c0_7 = arith.constant 0 : index
    %c0_8 = arith.constant 0 : index
    %9 = vector.load %arg5[%c0_7, %c0_8] : memref<128x256xf32, #tpu.memory_space<vmem>>, vector<128x256xf32>
    %cst_9 = arith.constant dense<0.000000e+00> : vector<16x256xf32>
    %10 = tpu.matmul %8, %9, %cst_9 {dimension_numbers = #tpu.dot_dimension_numbers<[1], [0], [0], [1], [0, 0, 1, 1], [], []>} : vector<16x128xf32>, vector<128x256xf32>, vector<16x256xf32> -> vector<16x256xf32>
    %c0_10 = arith.constant 0 : index
    %c0_11 = arith.constant 0 : index
    %11 = vector.load %arg6[%c0_10, %c0_11] : memref<1x256xf32, #tpu.memory_space<vmem>>, vector<1x256xf32>
    %12 = vector.broadcast %11 : vector<1x256xf32> to vector<16x256xf32>
    %13 = arith.addf %10, %12 : vector<16x256xf32>
    %14 = arith.mulf %13, %13 : vector<16x256xf32>
    %cst_12 = arith.constant dense<0.000000e+00> : vector<16xf32>
    %15 = vector.multi_reduction <add>, %14, %cst_12 [1] : vector<16x256xf32> to vector<16xf32>
    %16 = vector.shape_cast %15 : vector<16xf32> to vector<16x1xf32>
    %17 = math.sqrt %16 : vector<16x1xf32>
    %cst_13 = arith.constant 9.99999996E-13 : f32
    %18 = vector.broadcast %cst_13 : f32 to vector<16x1xf32>
    %19 = arith.maximumf %17, %18 : vector<16x1xf32>
    %cst_14 = arith.constant 1.000000e+00 : f32
    %20 = vector.broadcast %cst_14 : f32 to vector<16x1xf32>
    %21 = arith.divf %20, %19 : vector<16x1xf32>
    %22 = vector.broadcast %21 : vector<16x1xf32> to vector<16x256xf32>
    %23 = arith.mulf %13, %22 : vector<16x256xf32>
    %24 = arith.truncf %23 : vector<16x256xf32> to vector<16x256xbf16>
    %c0_15 = arith.constant 0 : index
    %c0_16 = arith.constant 0 : index
    %c0_17 = arith.constant 0 : index
    %25 = vector.load %arg7[%c0_15, %c0_16, %c0_17] : memref<1x16x256xbf16, #tpu.memory_space<vmem>>, vector<1x16x256xbf16>
    %26 = vector.shape_cast %25 : vector<1x16x256xbf16> to vector<16x256xbf16>
    %27 = vector.shape_cast %24 : vector<16x256xbf16> to vector<1x16x256xbf16>
    tpu.vector_store %arg7[%c0_15, %c0_16, %c0_17], %27 {strides = array<i32>} : memref<1x16x256xbf16, #tpu.memory_space<vmem>>, vector<1x16x256xbf16>,
    return
  }
  func.func @transform_0(%arg0: i32, %arg1: i32) -> (i32, i32, i32) {
    %c0_i32 = arith.constant 0 : i32
    %c0_i32_0 = arith.constant 0 : i32
    return %arg0, %arg1, %c0_i32 : i32, i32, i32
  }
  func.func @transform_1(%arg0: i32, %arg1: i32) -> (i32, i32) {
    %c0_i32 = arith.constant 0 : i32
    %c0_i32_0 = arith.constant 0 : i32
    %c0_i32_1 = arith.constant 0 : i32
    return %c0_i32, %c0_i32_0 : i32, i32
  }
  func.func @transform_2(%arg0: i32, %arg1: i32) -> (i32, i32) {
    %c0_i32 = arith.constant 0 : i32
    %c0_i32_0 = arith.constant 0 : i32
    %c0_i32_1 = arith.constant 0 : i32
    return %c0_i32, %c0_i32_0 : i32, i32
  }
  func.func @transform_3(%arg0: i32, %arg1: i32) -> (i32, i32) {
    %c0_i32 = arith.constant 0 : i32
    %c0_i32_0 = arith.constant 0 : i32
    %c0_i32_1 = arith.constant 0 : i32
    return %c0_i32, %c0_i32_0 : i32, i32
  }
  func.func @transform_4(%arg0: i32, %arg1: i32) -> (i32, i32) {
    %c0_i32 = arith.constant 0 : i32
    %c0_i32_0 = arith.constant 0 : i32
    %c0_i32_1 = arith.constant 0 : i32
    return %c0_i32, %c0_i32_0 : i32, i32
  }
  func.func @transform_5(%arg0: i32, %arg1: i32) -> (i32, i32, i32) {
    %c0_i32 = arith.constant 0 : i32
    %c0_i32_0 = arith.constant 0 : i32
    return %arg0, %arg1, %c0_i32 : i32, i32, i32
  }
}

</mosaic_0001>

<bundles_post_ra>
// kernel: scaled_dot_forward.3
= control target key start
LH: loop header
LB: loop body
LE: loop exit
PB: predicated region body
PF: predicated region fallthrough
CT: control target
= control target key end

     0   :  { %7 = vsyncpa [#allocation3], 0  ;;  %s700_s0 = inlined_call_operand.vmem [shape: bf16[2,16,256], index: 0, kind: input, shape index: {}, may-alias: {0,1}]   ;;  %s701_s1 = inlined_call_operand.vmem [shape: bf16[2,16,256], index: 1, kind: input, shape index: {}, may-alias: {0,1}]   ;;  %s702_s2 = inlined_call_operand.hbm [shape: f32[2,16,16], index: 2, kind: output, shape index: {}]  }
   0x1   :  { %9 = vsyncpa [#allocation3 + $0x1], 0  ;;  %s600_s9 = smov 0   ;;  %s602_s10 = smov 0  }
   0x2   :  { %s604_s11 = smov 0   ;;  %s606_s12 = smov 0  }
   0x3   :  { %s608_s13 = smov 0   ;;  %s610_s14 = smov 0  }
   0x4 LB: > { %s408_s15 = sadd.s32 4294967295, %s581_s14   ;;  %s409_s16 = sadd.s32 4294967294, %s581_s14   ;;  %s581_s14 = sphi %s610_s14, %s15_s14   ;;  %s577_s13 = sphi %s608_s13, %s709_s13   ;;  %s573_s12 = sphi %s606_s12, %s708_s12   ;;  %s569_s11 = sphi %s604_s11, %s707_s11   ;;  %s565_s10 = sphi %s602_s10, %s706_s10   ;;  %s561_s9 = sphi %s600_s9, %s705_s9  }
   0x5   : > { %s34_s17 = sadd.s32 1, %s577_s13  ;;  %s101_s18 = sadd.s32 1, %s569_s11 }
   0x6   : > { %p36_p0 = scmp.ge.s32.totalorder %s34_s17, 2  ;;  %p111_p1 = scmp.ne.s32.totalorder %s569_s11, %s565_s10 }
   0x7   : > { %p112_p2 = scmp.eq.s32.totalorder %s408_s15, 1  ;;  %p117_p3 = scmp.ne.s32.totalorder %s565_s10, %s561_s9 }
   0x8   : > { %s711_s17 = smov (%p36_p0, %s34_s17), 0  ;;  %p118_p5 = scmp.eq.s32.totalorder %s409_s16, 1 }
   0x9   : > { %p640_p4 = por %p112_p2, %p111_p1  ;;  %s94_s20 = ssub.s32 %s577_s13, %s711_s17 }
   0xa   : > { %p412_p6 = scmp.ge.s32.totalorder %s581_s14, 1  ;;  %p99_p7 = scmp.eq.s32.totalorder %s94_s20, 0 }
   0xb   : > { %p647_p8 = por %p118_p5, %p117_p3  ;;  %p164_p9 = scmp.lt.s32.totalorder %s581_s14, 3 }
   0xc   : > { %s653_s22 = scalar_select %p99_p7, %s569_s11, %s101_s18  }
   0xd   : > { %p165_p10 = pnand %p412_p6, %p164_p9 }
   0xe   : > { %p202_p11 = scmp.lt.s32.totalorder (!%p165_p10), %s573_s12, 1  ;;  %s198_s3 = sand.u32 (!%p165_p10), 1, %s565_s10  }
   0xf   : > { %168 = sbr.rel (%p165_p10) target bundleno = 177 (0xb1), region = 28  ;;  %s413_s4 = sshll.u32 (!%p165_p10), %s198_s3, 4 }
  0x10   : > { %s445_s5 = sshll.u32 (!%p165_p10), %s573_s12, 4  ;;  %s200_s15 = scalar_lea.vmem (!%p165_p10), [#allocation2], %s413_s4 }
  0x11   : > { %s297_s8 = scalar_lea.hbm (!%p165_p10), %s702_s2, %s445_s5  ;;  %s298_s16 = sshll.u32 (!%p165_p10), %s200_s15, 4  ;;  %s299_s16 = int_to_ptr.vmem [resolvable:$true] %s298_s16 }
  0x12   : > { %s300_s18 = sshll.u32 (!%p165_p10), %s297_s8, 4  ;;  %s283_s20 = scalar_lea.sflag (!%p165_p10), [#allocation3], %s198_s3  ;;  %s301_s18 = int_to_ptr.hbm [resolvable:$true] %s300_s18 }
  0x13   : > { %s523_s26 = scalar_lea.hbm (!%p165_p10), %s702_s2, 32 }
  0x14   : > { %s203_s23 = scalar_select %p202_p11, %s573_s12, 1  ;;  %vm279_vm0 = vcmask 130048  }
  0x15   : > { %s517_s12 = sshra.s32 %s301_s18, 4  ;;  %s518_s12 = int_to_ptr.hbm [resolvable:$true] %s517_s12 }
  0x16   : > { %s439_s24 = sshll.u32 %s203_s23, 4  ;;  %s519_s23 = scalar_lea.hbm %s518_s12, 16 }
  0x17   : > { %s221_s27 = scalar_lea.vmem %s701_s1, %s439_s24  ;;  %s210_s30 = scalar_lea.vmem %s700_s0, %s439_s24 }
  0x18   : > { %v428_v0 = vld [vmem:[%s221_s27] sm:$0xf]  ;;  %v444_v1 = vld [vmem:[%s221_s27 + $0x4] sm:$0xf0]  ;;  %v443_v2 = vld [vmem:[%s221_s27 + $0x4] sm:$0xf]  ;;  %p520_p12 = scmp.ne.s32.totalorder %s518_s12, %s519_s23  ;;  %p524_p1 = scmp.lt.s32.totalorder %s518_s12, %s702_s2 }
  0x19   : > { %v429_v3 = vor.u32 %v444_v1, %v428_v0  ;;  %v430_v4 = vld [vmem:[%s221_s27 + $0x8] sm:$0xf0]  ;;  %v420_v6 = vld [vmem:[%s210_s30] sm:$0xf]  ;;  %v442_v7 = vld [vmem:[%s210_s30 + $0x4] sm:$0xf0]  ;;  %p525_p2 = scmp.lt.s32.totalorder %s523_s26, %s519_s23 }
  0x1a   : > { %v433_v5 = vor.u32 %v443_v2, %v430_v4  ;;  %v441_v8 = vld [vmem:[%s210_s30 + $0x4] sm:$0xf]  ;;  %v422_v9 = vld [vmem:[%s210_s30 + $0x8] sm:$0xf0]  ;;  %v421_v10 = vor.u32 %v442_v7, %v420_v6  ;;  %p521_p13 = pnand %p520_p12, %p640_p4 }
  0x1b   : > { %256 = vmatpush.bf16.xpose.msra.mxu0 %v429_v3  ;;  %v425_v11 = vor.u32 %v441_v8, %v422_v9  ;;  %p526_p3 = por %p525_p2, %p524_p1 }
  0x1c   : > { %270 = vmatpush.bf16.xpose.msra.mxu1 %v433_v5  ;;  %p522_p0 = pneg %p521_p13 }
  0x1e   : > { %p527_p5 = pnand %p526_p3, %p522_p0 }
  0x22   : > { %257 = vmatmul.bf16.vlgmr.msra.gmra.mxu0 %v421_v10 }
  0x23   : > { %271 = vmatmul.bf16.vlgmr.msra.gmra.mxu1 %v425_v11 }
  0x9f   : > { %v258_v12 = vpop.f32.mrf.mxu0 }
  0xa0   : > { %v272_v13 = vpop.f32.mrf.mxu1 }
  0xa1   : > { %v273_v14 = vadd.f32 %v272_v13, %v258_v12 }
  0xa3   : > { %v277_v15 = vand.u32 2147483647, %v273_v14 }
  0xa5   : > { %280 = vst.msk [vmem:[%s200_s15] sm:$0xff] %vm279_vm0, %v277_v15 }
  0xa7   : > { %v260_v16 = vpop.f32.mrf.mxu0 }
  0xa8   : > { %v274_v17 = vpop.f32.mrf.mxu1 }
  0xa9   : > { %v275_v18 = vadd.f32 %v274_v17, %v260_v16 }
  0xab   : > { %v278_v19 = vand.u32 2147483647, %v275_v18 }
  0xad   : > { %281 = vst.msk [vmem:[%s200_s15 + $0x8] sm:$0xff] %vm279_vm0, %v278_v19 }
  0xae   : > { %530 = shalt.err (!%p527_p5)
}
  0xaf   : > { %s583_s29 = smov 128   ;;  %s584_s30 = smov 8  }
  0xb0   : > { %446 = dma.vmem_to_hbm [thread:$0]  (%p640_p4), %s299_s16, 256, %s301_s18, %s283_s20, %s583_s29, %s583_s29, %s584_s30  }
  0xb1 PF: > { %p452_p6 = scmp.ge.s32.totalorder %s581_s14, 2  ;;  %s315_s3 = sand.u32 1, %s561_s9  }
  0xb2   : > { %s316_s4 = scalar_lea.sflag [#allocation3], %s315_s3 }
  0xb3   : > { %p449_p7 = pnand %p452_p6, %p647_p8 }
  0xb5   : > { %p450_p9 = pneg %p449_p7 }
  0xb7   : > { %556 = dma.done.wait (%p450_p9), %s316_s4, 256  }
  0xb8   : > { %558 = vsyncadd (%p450_p9), %s316_s4, 4294967040  ;;  %s15_s14 = sadd.s32 1, %s581_s14   ;;  %s705_s9 = smov %s565_s10 }
  0xb9   : > { %p12_p10 = scmp.ge.s32.totalorder %s15_s14, 4   ;;  %s706_s10 = smov %s569_s11 }
  0xba   : > { %s707_s11 = smov %s653_s22  ;;  %s708_s12 = smov %s577_s13 }
  0xbb   : > { %s709_s13 = smov %s711_s17  ;;  %14 = sbr.rel (!%p12_p10) target bundleno = 4 (0x4), region = 66 }
  0xc0   :  { %322 = vsyncpa [#allocation3], 1 }
  0xc1   :  { %324 = vsyncpa [#allocation3 + $0x1], 1 }

// kernel: scaled_dot_forward.2
= control target key start
LH: loop header
LB: loop body
LE: loop exit
PB: predicated region body
PF: predicated region fallthrough
CT: control target
= control target key end

     0   :  { %10 = vsyncpa [#allocation3], 0  ;;  %s771_s18 = smov 0   ;;  %s773_s19 = smov 0   ;;  %s836_s0 = inlined_call_operand.vmem [shape: f32[2,16,8], index: 0, kind: input, shape index: {}]   ;;  %s837_s1 = inlined_call_operand.vmem [shape: f32[8,128], index: 1, kind: input, shape index: {}]   ;;  %s838_s2 = inlined_call_operand.vmem [shape: f32[1,128], index: 2, kind: input, shape index: {}]   ;;  %s839_s3 = inlined_call_operand.hbm [shape: f32[128,256], index: 3, kind: input, shape index: {}]   ;;  %s840_s4 = inlined_call_operand.vmem [shape: f32[1,256], index: 4, kind: input, shape index: {}]   ;;  %s841_s5 = inlined_call_operand.vmem [shape: bf16[2,16,256], index: 5, kind: output, shape index: {}]  }
   0x1   :  { %s775_s20 = smov 0  }
   0x2 LB: > { %s585_s21 = sadd.s32 4294967295, %s736_s20   ;;  %s28_s22 = sadd.s32 1, %s732_s19  ;;  %s736_s20 = sphi %s775_s20, %s16_s20   ;;  %s732_s19 = sphi %s773_s19, %s843_s19   ;;  %s728_s18 = sphi %s771_s18, %s842_s18  }
   0x3   : > { %p30_p0 = scmp.ge.s32.totalorder %s28_s22, 2  ;;  %p587_p1 = scmp.ge.s32.totalorder %s736_s20, 1 }
   0x4   : > { %p173_p2 = scmp.lt.s32.totalorder %s736_s20, 3  ;;  %p642_p4 = scmp.eq.s32.totalorder %s585_s21, 0 }
   0x5   : > { %s845_s22 = smov (%p30_p0, %s28_s22), 0  ;;  %s190_s25 = sshll.u32 %s839_s3, 4  ;;  %s191_s25 = int_to_ptr.hbm [resolvable:$true] %s190_s25 }
   0x6   : > { %p174_p3 = pnand %p587_p1, %p173_p2  ;;  %s738_s26 = smov [#allocation2]  }
   0x7   : > { %s192_s27 = sshll.u32 %s738_s26, 4  ;;  %s739_s28 = smov 256   ;;  %s193_s27 = int_to_ptr.vmem [resolvable:$true] %s192_s27 }
   0x8   : > { %p638_p5 = pneg %p174_p3  ;;  %s740_s29 = smov 16  }
   0x9   : > { %224 = sbr.rel (%p174_p3) target bundleno = 458 (0x1ca), region = 40 }
   0xa   : > { %p639_p6 = pnand %p642_p4, %p638_p5 }
   0xc   : > { %641 = dma.hbm_to_vmem [thread:$0]  (!%p639_p6), %s191_s25, 4096, %s193_s27, [#allocation3], %s739_s28, %s739_s28, %s740_s29  }
   0xe   : > { %723 = dma.done.wait (%p642_p4), [#allocation3], 4096  }
   0xf   : > { %725 = vsyncadd (%p642_p4), [#allocation3], 4294963200  ;;  %p263_p7 = scmp.lt.s32.totalorder %s728_s18, 1  ;;  %vm290_vm0 = vcmask 64512   ;;  %v285_v0 = vld [vmem:[%s837_s1] sm:$0xff]  ;;  %v352_v2 = vld [vmem:[#allocation2 + $0xf0] sm:$0xff] }
  0x10   : > { %312 = vmatpush.msra.mxu0 %v285_v0  ;;  %v353_v3 = vld [vmem:[#allocation2 + $0xf8] sm:$0xff]  ;;  %v350_v4 = vld [vmem:[#allocation2 + $0xe0] sm:$0xff]  ;;  %360 = vmatpush.msra.mxu1 %v352_v2  ;;  %v351_v5 = vld [vmem:[#allocation2 + $0xe8] sm:$0xff] }
  0x11   : > { %s847_s18 = smov (!%p263_p7, %s728_s18), 1  ;;  %v348_v6 = vld [vmem:[#allocation2 + $0xd0] sm:$0xff]  ;;  %602 = vmatpush.msra.mxu3 %v352_v2  ;;  %v349_v7 = vld [vmem:[#allocation2 + $0xd8] sm:$0xff]  ;;  %618 = vmatpush.msra.mxu2 %v353_v3  ;;  %v346_v8 = vld [vmem:[#allocation2 + $0xc0] sm:$0xff] }
  0x12   : > { %s600_s30 = sshll.u32 %s847_s18, 4  ;;  %383 = vmatpush.msrb.mxu0 %v353_v3  ;;  %361 = vmatpush.msra.mxu1 %v350_v4  ;;  %v347_v9 = vld [vmem:[#allocation2 + $0xc8] sm:$0xff]  ;;  %v344_v11 = vld [vmem:[#allocation2 + $0xb0] sm:$0xff]  ;;  %v345_v12 = vld [vmem:[#allocation2 + $0xb8] sm:$0xff] }
  0x13   : > { %s270_s8 = scalar_lea.vmem %s836_s0, %s600_s30  ;;  %603 = vmatpush.msra.mxu3 %v350_v4  ;;  %619 = vmatpush.msra.mxu2 %v351_v5  ;;  %v342_v13 = vld [vmem:[#allocation2 + $0xa0] sm:$0xff]  ;;  %v343_v14 = vld [vmem:[#allocation2 + $0xa8] sm:$0xff]  ;;  %v340_v15 = vld [vmem:[#allocation2 + $0x90] sm:$0xff]  ;;  %s281_s17 = scalar_lea.vmem %s841_s5, %s600_s30 }
  0x14   : > { %v283_v1 = vld [vmem:[%s270_s8] sm:$0xff]  ;;  %384 = vmatpush.msrb.mxu0 %v351_v5  ;;  %362 = vmatpush.msra.mxu1 %v348_v6  ;;  %v284_v10 = vld [vmem:[%s270_s8 + $0x8] sm:$0xff]  ;;  %v341_v16 = vld [vmem:[#allocation2 + $0x98] sm:$0xff] }
  0x15   : > { %596 = vmatmul.msk.f32.vlgmr.msra.gmra.mxu0 %vm290_vm0, %v283_v1  ;;  %604 = vmatpush.msra.mxu3 %v348_v6  ;;  %v338_v17 = vld [vmem:[#allocation2 + $0x80] sm:$0xff]  ;;  %v339_v18 = vld [vmem:[#allocation2 + $0x88] sm:$0xff]  ;;  %v336_v19 = vld [vmem:[#allocation2 + $0x70] sm:$0xff] }
  0x16   : > { %385 = vmatpush.msrb.mxu0 %v349_v7  ;;  %363 = vmatpush.msra.mxu1 %v346_v8  ;;  %v337_v20 = vld [vmem:[#allocation2 + $0x78] sm:$0xff]  ;;  %v334_v21 = vld [vmem:[#allocation2 + $0x60] sm:$0xff]  ;;  %v335_v22 = vld [vmem:[#allocation2 + $0x68] sm:$0xff] }
  0x17   : > { %620 = vmatpush.msra.mxu2 %v349_v7  ;;  %605 = vmatpush.msra.mxu3 %v346_v8  ;;  %v332_v23 = vld [vmem:[#allocation2 + $0x50] sm:$0xff]  ;;  %v333_v24 = vld [vmem:[#allocation2 + $0x58] sm:$0xff]  ;;  %v330_v25 = vld [vmem:[#allocation2 + $0x40] sm:$0xff] }
  0x18   : > { %386 = vmatpush.msrb.mxu0 %v347_v9  ;;  %364 = vmatpush.msra.mxu1 %v344_v11  ;;  %v331_v26 = vld [vmem:[#allocation2 + $0x48] sm:$0xff]  ;;  %v328_v27 = vld [vmem:[#allocation2 + $0x30] sm:$0xff]  ;;  %v329_v28 = vld [vmem:[#allocation2 + $0x38] sm:$0xff] }
  0x19   : > { %621 = vmatpush.msra.mxu2 %v347_v9  ;;  %606 = vmatpush.msra.mxu3 %v344_v11  ;;  %v326_v29 = vld [vmem:[#allocation2 + $0x20] sm:$0xff]  ;;  %v327_v30 = vld [vmem:[#allocation2 + $0x28] sm:$0xff]  ;;  %v324_v31 = vld [vmem:[#allocation2 + $0x10] sm:$0xff] }
  0x1a   : > { %387 = vmatpush.msrb.mxu0 %v345_v12  ;;  %365 = vmatpush.msra.mxu1 %v342_v13  ;;  %v325_v32 = vld [vmem:[#allocation2 + $0x18] sm:$0xff]  ;;  %v322_v33 = vld [vmem:[#allocation2] sm:$0xff]  ;;  %v323_v34 = vld [vmem:[#allocation2 + $0x8] sm:$0xff] }
  0x1b   : > { %622 = vmatpush.msra.mxu2 %v345_v12  ;;  %607 = vmatpush.msra.mxu3 %v342_v13  ;;  %v671_v35 = vld [vmem:[%s838_s2] ss:$0 sm:$0xff] }
  0x1c   : > { %388 = vmatpush.msrb.mxu0 %v343_v14  ;;  %366 = vmatpush.msra.mxu1 %v340_v15  ;;  %v354_v42 = vld [vmem:[%s840_s4] sm:$0x3] }
  0x1d   : > { %597 = vmatmul.msk.f32.gmra.mxu0 %vm290_vm0, %v284_v10  ;;  %623 = vmatpush.msra.mxu2 %v343_v14  ;;  %v356_v43 = vperm.slane %v354_v42, 0  ;;  %v357_v44 = vperm.slane %v354_v42, 1 }
  0x1e   : > { %389 = vmatpush.msrb.mxu0 %v341_v16  ;;  %367 = vmatpush.msra.mxu1 %v338_v17 }
  0x1f   : > { %608 = vmatpush.msra.mxu3 %v340_v15  ;;  %624 = vmatpush.msra.mxu2 %v341_v16 }
  0x20   : > { %390 = vmatpush.msrb.mxu0 %v339_v18  ;;  %368 = vmatpush.msra.mxu1 %v336_v19 }
  0x21   : > { %609 = vmatpush.msra.mxu3 %v338_v17  ;;  %625 = vmatpush.msra.mxu2 %v339_v18 }
  0x22   : > { %391 = vmatpush.msrb.mxu0 %v337_v20  ;;  %369 = vmatpush.msra.mxu1 %v334_v21 }
  0x23   : > { %610 = vmatpush.msra.mxu3 %v336_v19  ;;  %626 = vmatpush.msra.mxu2 %v337_v20 }
  0x24   : > { %392 = vmatpush.msrb.mxu0 %v335_v22  ;;  %370 = vmatpush.msra.mxu1 %v332_v23 }
  0x25   : > { %611 = vmatpush.msra.mxu3 %v334_v21  ;;  %627 = vmatpush.msra.mxu2 %v335_v22 }
  0x26   : > { %393 = vmatpush.msrb.mxu0 %v333_v24  ;;  %371 = vmatpush.msra.mxu1 %v330_v25 }
  0x27   : > { %612 = vmatpush.msra.mxu3 %v332_v23  ;;  %628 = vmatpush.msra.mxu2 %v333_v24 }
  0x28   : > { %394 = vmatpush.msrb.mxu0 %v331_v26  ;;  %372 = vmatpush.msra.mxu1 %v328_v27 }
  0x29   : > { %613 = vmatpush.msra.mxu3 %v330_v25  ;;  %629 = vmatpush.msra.mxu2 %v331_v26 }
  0x2a   : > { %395 = vmatpush.msrb.mxu0 %v329_v28  ;;  %373 = vmatpush.msra.mxu1 %v326_v29 }
  0x2b   : > { %614 = vmatpush.msra.mxu3 %v328_v27  ;;  %630 = vmatpush.msra.mxu2 %v329_v28 }
  0x2c   : > { %396 = vmatpush.msrb.mxu0 %v327_v30  ;;  %374 = vmatpush.msra.mxu1 %v324_v31 }
  0x2d   : > { %615 = vmatpush.msra.mxu3 %v326_v29  ;;  %631 = vmatpush.msra.mxu2 %v327_v30 }
  0x2e   : > { %397 = vmatpush.msrb.mxu0 %v325_v32  ;;  %375 = vmatpush.msra.mxu1 %v322_v33 }
  0x2f   : > { %616 = vmatpush.msra.mxu3 %v324_v31  ;;  %632 = vmatpush.msra.mxu2 %v325_v32 }
  0x30   : > { %398 = vmatpush.msrb.mxu0 %v323_v34 }
  0x31   : > { %617 = vmatpush.msra.mxu3 %v322_v33  ;;  %633 = vmatpush.msra.mxu2 %v323_v34 }
  0x92   : > { %v314_v36 = vpop.f32.mrf.mxu0 }
  0x93   : > { %v315_v37 = vadd.f32 %v671_v35, %v314_v36 }
  0x95   : > { %v320_v38 = vmax.f32 %v315_v37, 0.0 }
  0x97   : > { %376 = vmatmul.f32.vlgmr.msra.gmra.mxu1 %v320_v38  ;;  %399 = vmatmul.f32.vlgmr.msrb.gmra.mxu0 %v320_v38 }
  0x9a   : > { %v317_v39 = vpop.f32.mrf.mxu0 }
  0x9b   : > { %v318_v40 = vadd.f32 %v671_v35, %v317_v39 }
  0x9d   : > { %v321_v41 = vmax.f32 %v318_v40, 0.0 }
  0x9f   : > { %379 = vmatmul.f32.vlgmr.msra.gmra.mxu3 %v321_v41  ;;  %402 = vmatmul.f32.vlgmr.msra.gmra.mxu2 %v321_v41 }
 0x114   : > { %v377_v45 = vpop.f32.mrf.mxu1  ;;  %v400_v46 = vpop.f32.mrf.mxu0 }
 0x115   : > { %v378_v47 = vadd.f32 %v377_v45, %v356_v43  ;;  %v401_v48 = vadd.f32 %v400_v46, %v357_v44 }
 0x117   : > { %v406_v49 = vmul.f32 %v378_v47, %v378_v47  ;;  %v407_v50 = vmul.f32 %v401_v48, %v401_v48 }
 0x119   : > { %v410_v51 = vadd.f32 %v407_v50, %v406_v49 }
 0x11b   : > { %411 = vadd.xlane.f32.xlu0 %v410_v51 }
 0x122   : > { %v380_v52 = vpop.f32.mrf.mxu3  ;;  %v403_v53 = vpop.f32.mrf.mxu2 }
 0x123   : > { %v812_v54 = vadd.f32 %v380_v52, %v356_v43  ;;  %v814_v55 = vadd.f32 %v403_v53, %v357_v44 }
 0x125   : > { %v408_v56 = vmul.f32 %v812_v54, %v812_v54  ;;  %v409_v57 = vmul.f32 %v814_v55, %v814_v55 }
 0x127   : > { %v413_v58 = vadd.f32 %v409_v57, %v408_v56 }
 0x129   : > { %414 = vadd.xlane.f32.xlu0 %v413_v58 }
 0x18e   : > { %v412_v59 = vpop.xlane.xlu0 %411 }
 0x18f   : > { %672 = vrsqrt.f32 %v412_v59  ;;  %vm423_vm1 = vcmp.eq.f32.partialorder %v412_v59, inf  ;;  %v426_v4 = vand.u32 2147483648, %v412_v59  ;;  %vm425_vm2 = vcmp.eq.f32.partialorder %v412_v59, 0.0 }
 0x195   : > { %v673_v60 = vpop.eup %672 }
 0x196   : > { %v417_v61 = vmul.f32 %v673_v60, %v412_v59 }
 0x198   : > { %v418_v62 = vmul.f32 %v673_v60, %v417_v61 }
 0x19a   : > { %v419_v63 = vmul.f32 0.5, %v418_v62 }
 0x19c   : > { %v420_v0 = vsub.f32 1.5, %v419_v63  ;;  %v415_v1 = vpop.xlane.xlu0 %414 }
 0x19d   : > { %674 = vrsqrt.f32 %v415_v1  ;;  %vm435_vm3 = vcmp.eq.f32.partialorder %v415_v1, inf  ;;  %vm437_vm4 = vcmp.eq.f32.partialorder %v415_v1, 0.0  ;;  %v438_v19 = vand.u32 2147483648, %v415_v1 }
 0x19e   : > { %v421_v2 = vmul.f32 %v673_v60, %v420_v0 }
 0x1a0   : > { %v422_v3 = vmul.f32 %v421_v2, %v412_v59 }
 0x1a2   : > { %v424_v5 = vsel %vm423_vm1, %v412_v59, %v422_v3 }
 0x1a3   : > { %v675_v6 = vpop.eup %674  ;;  %v427_v7 = vsel %vm425_vm2, %v426_v4, %v424_v5 }
 0x1a4   : > { %v440_v8 = vmax.f32 %v427_v7, 1e-12  ;;  %v429_v9 = vmul.f32 %v675_v6, %v415_v1 }
 0x1a6   : > { %676 = vrcp.f32 %v440_v8  ;;  %v430_v10 = vmul.f32 %v675_v6, %v429_v9  ;;  %v453_v18 = vand.u32 2147483648, %v440_v8  ;;  %v451_v21 = vand.u32 2147483647, %v440_v8 }
 0x1a7   : > { %vm447_vm6 = vweird.f32 %v440_v8 }
 0x1a8   : > { %v431_v11 = vmul.f32 0.5, %v430_v10  ;;  %v454_v26 = vor.u32 1.1754944e-38, %v453_v18  ;;  %vm452_vm8 = vcmp.eq.f32.partialorder %v451_v21, 8.507059e+37 }
 0x1aa   : > { %v432_v12 = vsub.f32 1.5, %v431_v11 }
 0x1ac   : > { %v677_v13 = vpop.eup %676  ;;  %v433_v15 = vmul.f32 %v675_v6, %v432_v12 }
 0x1ad   : > { %v443_v14 = vmul.f32 %v677_v13, %v440_v8  ;;  %vm448_vm5 = vweird.f32 %v677_v13 }
 0x1ae   : > { %v434_v17 = vmul.f32 %v433_v15, %v415_v1  ;;  %vm449_vm7 = vmor %vm447_vm6, %vm448_vm5 }
 0x1af   : > { %v444_v16 = vsub.f32 1.0, %v443_v14 }
 0x1b0   : > { %v436_v22 = vsel %vm435_vm3, %v415_v1, %v434_v17 }
 0x1b1   : > { %v445_v20 = vmul.f32 %v677_v13, %v444_v16  ;;  %v439_v23 = vsel %vm437_vm4, %v438_v19, %v436_v22 }
 0x1b2   : > { %v441_v25 = vmax.f32 %v439_v23, 1e-12 }
 0x1b3   : > { %v446_v24 = vadd.f32 %v677_v13, %v445_v20 }
 0x1b4   : > { %678 = vrcp.f32 %v441_v25  ;;  %v468_v35 = vand.u32 2147483648, %v441_v25  ;;  %v466_v37 = vand.u32 2147483647, %v441_v25  ;;  %vm462_vm10 = vweird.f32 %v441_v25 }
 0x1b5   : > { %v450_v27 = vsel %vm449_vm7, %v677_v13, %v446_v24 }
 0x1b6   : > { %v455_v28 = vsel %vm452_vm8, %v454_v26, %v450_v27  ;;  %v469_v39 = vor.u32 1.1754944e-38, %v468_v35  ;;  %vm467_vm12 = vcmp.eq.f32.partialorder %v466_v37, 8.507059e+37 }
 0x1b7   : > { %v472_v29 = vmul.f32 %v455_v28, %v378_v47  ;;  %v473_v30 = vmul.f32 %v455_v28, %v401_v48 }
 0x1b9   : > { %v476_v31 = vpack.c.bf16 %v473_v30, %v472_v29 }
 0x1ba   : > { %v679_v32 = vpop.eup %678 }
 0x1bb   : > { %478 = vst [vmem:[%s281_s17] sm:$0xff] %v476_v31  ;;  %v458_v33 = vmul.f32 %v679_v32, %v441_v25  ;;  %vm463_vm9 = vweird.f32 %v679_v32 }
 0x1bc   : > { %vm464_vm11 = vmor %vm462_vm10, %vm463_vm9 }
 0x1bd   : > { %v459_v34 = vsub.f32 1.0, %v458_v33 }
 0x1bf   : > { %v460_v36 = vmul.f32 %v679_v32, %v459_v34 }
 0x1c1   : > { %v461_v38 = vadd.f32 %v679_v32, %v460_v36 }
 0x1c3   : > { %v465_v40 = vsel %vm464_vm11, %v679_v32, %v461_v38 }
 0x1c4   : > { %v470_v41 = vsel %vm467_vm12, %v469_v39, %v465_v40 }
 0x1c5   : > { %v474_v42 = vmul.f32 %v470_v41, %v812_v54  ;;  %v475_v43 = vmul.f32 %v470_v41, %v814_v55 }
 0x1c7   : > { %v477_v44 = vpack.c.bf16 %v475_v43, %v474_v42 }
 0x1c9   : > { %479 = vst [vmem:[%s281_s17 + $0x8] sm:$0xff] %v477_v44 }
 0x1ca PF: > { %s16_s20 = sadd.s32 1, %s736_s20   ;;  %s842_s18 = smov %s732_s19 }
 0x1cb   : > { %p13_p8 = scmp.ge.s32.totalorder %s16_s20, 4   ;;  %s843_s19 = smov %s845_s22 }
 0x1cd   :  { %15 = sbr.rel (!%p13_p8) target bundleno = 2 (0x2), region = 75 }
 0x1d2   :  { %512 = vsyncpa [#allocation3], 1 }
 0x1d3   :  { %514 = vsyncpa [#allocation3 + $0x1], 1 }

</bundles_post_ra>
